<compile_context>
chip_gen: v6e
topology: v6e:2x2x1
jax: 0.10.0
libtpu: 0.0.40
codegen_flags: <defaults>
</compile_context>

<pallas_src>
import jax
import jax.numpy as jnp
from jax.experimental import pallas as pl
from jax.experimental.pallas import tpu as pltpu

BITS_A = 8
BITS_W = 8
LANES = 128


def _round_up(x, m):
    return ((x + m - 1) // m) * m


def _delta(bits):
    return 2.0 ** (1 - bits)


def _quant_act(x, bits=BITS_A):
    d = _delta(bits)
    x = jnp.clip(x, d - 1.0, 1.0 - d)          # clip first ...
    return jnp.round(x / d) * d                # ... then quantize  (qa)


def _quant_weight(w, bits=BITS_W):
    d = _delta(bits)
    w = jnp.round(w / d) * d                   # quantize first ...
    return jnp.clip(w, d - 1.0, 1.0 - d)       # ... then clip      (qw)


# ----------------------------------------------------------------------------
# Kernel: quantize activations + one MXU matmul + bias over a flat row tile.
#   p_ref : (TM, KKC)      f32   (im2col patch rows for this grid step)
#   w_ref : (KKC, CO)      bf16  (pre-quantized weights, resident)
#   b_ref : (1, CO)        f32   (bias, resident)
#   o_ref : (TM, CO)       f32
# ----------------------------------------------------------------------------
def _conv_kernel(p_ref, w_ref, b_ref, o_ref):
    # Quantize (exact m/128 values) and cast to bf16 right away (lossless).
    pq = _quant_act(p_ref[...]).astype(jnp.bfloat16)
    acc = jnp.dot(pq, w_ref[...], preferred_element_type=jnp.float32)
    o_ref[...] = acc + b_ref[...]


# ----------------------------------------------------------------------------
# Wrappers
# ----------------------------------------------------------------------------
def my_conv_nhwc(x_nhwc, weight_oihw, bias):
    """Primary entry point.

    x: (N, H, W, Cin) f32, weight: (Cout, Cin, K, K) f32, bias: (Cout,) f32.
    Returns (N, Ho, Wo, Cout) f32 with Ho = H-K+1, Wo = W-K+1 (stride 1, valid).
    """
    N, H, W, Cin = x_nhwc.shape
    Cout, _, K, _ = weight_oihw.shape
    Ho, Wo = H - K + 1, W - K + 1
    KKC = K * K * Cin
    M = N * Ho * Wo

    # --- wrapper-side im2col (XLA): column order (kh, kw, ci) -----------------
    cols = [x_nhwc[:, kh:kh + Ho, kw:kw + Wo, :]
            for kh in range(K) for kw in range(K)]
    patches = jnp.stack(cols, axis=3)                     # (N, Ho, Wo, K*K, Cin)
    patches = patches.reshape(M, KKC).astype(jnp.float32)  # (M, KKC)

    # --- weights: quantize once in XLA, HWIO order matches (kh, kw, ci) -------
    wq = _quant_weight(weight_oihw.astype(jnp.float32))
    w_mat = jnp.transpose(wq, (2, 3, 1, 0)).reshape(KKC, Cout)
    w_mat = w_mat.astype(jnp.bfloat16)                     # exact m/128 values

    # Lane-dense output only pays when Cout is large; small Cout stores direct.
    cout_out = _round_up(Cout, LANES) if Cout >= 64 else Cout
    if cout_out != Cout:
        w_mat = jnp.pad(w_mat, ((0, 0), (0, cout_out - Cout)))
        b_out = jnp.pad(bias, (0, cout_out - Cout))
    else:
        b_out = bias
    b_out = b_out.reshape(1, cout_out).astype(jnp.float32)

    # --- row tiling: ~4 grid steps (>=2 per v7x core), capped block size ------
    TM = max(8, min(2048, _round_up(pl.cdiv(M, 4), 8)))
    M_pad = _round_up(M, TM)
    if M_pad != M:
        patches = jnp.pad(patches, ((0, M_pad - M), (0, 0)))
    grid = M_pad // TM

    out_flat = pl.pallas_call(
        _conv_kernel,
        out_shape=jax.ShapeDtypeStruct((M_pad, cout_out), jnp.float32),
        grid=(grid,),
        in_specs=[
            pl.BlockSpec((TM, KKC), lambda m: (m, 0)),        # pipelined rows
            pl.BlockSpec((KKC, cout_out), lambda m: (0, 0)),  # resident weights
            pl.BlockSpec((1, cout_out), lambda m: (0, 0)),    # resident bias
        ],
        out_specs=pl.BlockSpec((TM, cout_out), lambda m: (m, 0)),
        compiler_params=pltpu.CompilerParams(
            dimension_semantics=("parallel",),     # v7x: 2 TCs split the tiles
            vmem_limit_bytes=32 * 1024 * 1024,     # blocks are a few MiB max
        ),
    )(patches, w_mat, b_out)

    out = out_flat[:M]
    if cout_out != Cout:
        out = out[:, :Cout]
    return out.reshape(N, Ho, Wo, Cout)


def my_conv(x_nchw, weight_oihw, bias):
    """PyTorch-layout adapter (NCHW in / NCHW out).

    Note: adds two full-tensor HBM transposes around the kernel; prefer
    my_conv_nhwc on the hot path.
    """
    x_nhwc = jnp.transpose(x_nchw, (0, 2, 3, 1))
    out_nhwc = my_conv_nhwc(x_nhwc, weight_oihw, bias)
    return jnp.transpose(out_nhwc, (0, 3, 1, 2))


# ----------------------------------------------------------------------------
# Pure-JAX reference (same math) for a sanity check.
# ----------------------------------------------------------------------------
def _reference_nhwc(x_nhwc, weight_oihw, bias):
    xq = _quant_act(x_nhwc)
    wq = _quant_weight(weight_oihw)
    w_hwio = jnp.transpose(wq, (2, 3, 1, 0))
    y = jax.lax.conv_general_dilated(
        xq, w_hwio, window_strides=(1, 1), padding="VALID",
        dimension_numbers=("NHWC", "HWIO", "NHWC"),
        preferred_element_type=jnp.float32)
    return y + bias[None, None, None, :]


if __name__ == "__main__":
    # Small shapes consistent with the module's forward.
    N, Cin, H, W = 2, 4, 16, 16
    Cout, K = 8, 3

    key = jax.random.PRNGKey(0)
    kx, kw_, kb = jax.random.split(key, 3)

    x_nhwc = jax.random.normal(kx, (N, H, W, Cin), dtype=jnp.float32)
    # Mimic nn.Conv2d default init: U(-1/sqrt(fan_in), +1/sqrt(fan_in)).
    fan_in = Cin * K * K
    bound = 1.0 / (fan_in ** 0.5)
    weight = jax.random.uniform(kw_, (Cout, Cin, K, K), jnp.float32, -bound, bound)
    bias = jax.random.uniform(kb, (Cout,), jnp.float32, -bound, bound)

    # Primary NHWC path (no wrapper transposes).
    out = jax.block_until_ready(my_conv_nhwc(x_nhwc, weight, bias))
    ref = jax.block_until_ready(_reference_nhwc(x_nhwc, weight, bias))
    assert out.shape == (N, H - K + 1, W - K + 1, Cout)
    assert jnp.allclose(out, ref, atol=1e-4, rtol=1e-4)

    # PyTorch-layout (NCHW) adapter, for module-faithful interfacing.
    x_nchw = jnp.transpose(x_nhwc, (0, 3, 1, 2))
    out_nchw = jax.block_until_ready(my_conv(x_nchw, weight, bias))
    ref_nchw = jnp.transpose(ref, (0, 3, 1, 2))
    assert out_nchw.shape == (N, Cout, H - K + 1, W - K + 1)
    assert jnp.allclose(out_nchw, ref_nchw, atol=1e-4, rtol=1e-4)

    print("KERNEL_OK")
</pallas_src>

<mosaic_0001>
module attributes {stable_mosaic.version = 11 : i64} {
  func.func @_conv_kernel(%arg0: i32, %arg1: memref<104x36xf32, #tpu.memory_space<vmem>>, %arg2: memref<36x8xbf16, #tpu.memory_space<vmem>>, %arg3: memref<1x8xf32, #tpu.memory_space<vmem>>, %arg4: memref<104x8xf32, #tpu.memory_space<vmem>>) attributes {dimension_semantics = [#tpu.dimension_semantics<parallel>], iteration_bounds = array<i64: 4>, scalar_prefetch = 0 : i64, scratch_operands = 0 : i64, tpu.core_type = #tpu.core_type<tc>, window_params = [{transform_indices = @transform_0, window_bounds = array<i64: 104, 36>}, {pipeline_mode = #tpu.pipeline_mode<synchronous>, transform_indices = @transform_1, window_bounds = array<i64: 36, 8>}, {pipeline_mode = #tpu.pipeline_mode<synchronous>, transform_indices = @transform_2, window_bounds = array<i64: 1, 8>}, {transform_indices = @transform_3, window_bounds = array<i64: 104, 8>}]} {
    %c0 = arith.constant 0 : index
    %c0_0 = arith.constant 0 : index
    %0 = vector.load %arg1[%c0, %c0_0] : memref<104x36xf32, #tpu.memory_space<vmem>>, vector<104x36xf32>
    %cst = arith.constant -0.9921875 : f32
    %cst_1 = arith.constant 0.9921875 : f32
    %1 = vector.broadcast %cst : f32 to vector<104x36xf32>
    %2 = arith.maximumf %1, %0 : vector<104x36xf32>
    %3 = vector.broadcast %cst_1 : f32 to vector<104x36xf32>
    %4 = arith.minimumf %3, %2 : vector<104x36xf32>
    %cst_2 = arith.constant 7.812500e-03 : f32
    %5 = vector.broadcast %cst_2 : f32 to vector<104x36xf32>
    %6 = arith.divf %4, %5 : vector<104x36xf32>
    %7 = math.roundeven %6 : vector<104x36xf32>
    %cst_3 = arith.constant 7.812500e-03 : f32
    %8 = vector.broadcast %cst_3 : f32 to vector<104x36xf32>
    %9 = arith.mulf %7, %8 : vector<104x36xf32>
    %10 = arith.truncf %9 : vector<104x36xf32> to vector<104x36xbf16>
    %c0_4 = arith.constant 0 : index
    %c0_5 = arith.constant 0 : index
    %11 = vector.load %arg2[%c0_4, %c0_5] : memref<36x8xbf16, #tpu.memory_space<vmem>>, vector<36x8xbf16>
    %cst_6 = arith.constant dense<0.000000e+00> : vector<104x8xf32>
    %12 = tpu.matmul %10, %11, %cst_6 {dimension_numbers = #tpu.dot_dimension_numbers<[1], [0], [0], [1], [0, 0, 1, 1], [], []>} : vector<104x36xbf16>, vector<36x8xbf16>, vector<104x8xf32> -> vector<104x8xf32>
    %c0_7 = arith.constant 0 : index
    %c0_8 = arith.constant 0 : index
    %13 = vector.load %arg3[%c0_7, %c0_8] : memref<1x8xf32, #tpu.memory_space<vmem>>, vector<1x8xf32>
    %14 = vector.broadcast %13 : vector<1x8xf32> to vector<104x8xf32>
    %15 = arith.addf %12, %14 : vector<104x8xf32>
    %c0_9 = arith.constant 0 : index
    %c0_10 = arith.constant 0 : index
    %16 = vector.load %arg4[%c0_9, %c0_10] : memref<104x8xf32, #tpu.memory_space<vmem>>, vector<104x8xf32>
    tpu.vector_store %arg4[%c0_9, %c0_10], %15 {strides = array<i32>} : memref<104x8xf32, #tpu.memory_space<vmem>>, vector<104x8xf32>,
    return
  }
  func.func @transform_0(%arg0: i32) -> (i32, i32) {
    %c0_i32 = arith.constant 0 : i32
    %c0_i32_0 = arith.constant 0 : i32
    return %arg0, %c0_i32 : i32, i32
  }
  func.func @transform_1(%arg0: i32) -> (i32, i32) {
    %c0_i32 = arith.constant 0 : i32
    %c0_i32_0 = arith.constant 0 : i32
    %c0_i32_1 = arith.constant 0 : i32
    return %c0_i32, %c0_i32_0 : i32, i32
  }
  func.func @transform_2(%arg0: i32) -> (i32, i32) {
    %c0_i32 = arith.constant 0 : i32
    %c0_i32_0 = arith.constant 0 : i32
    %c0_i32_1 = arith.constant 0 : i32
    return %c0_i32, %c0_i32_0 : i32, i32
  }
  func.func @transform_3(%arg0: i32) -> (i32, i32) {
    %c0_i32 = arith.constant 0 : i32
    %c0_i32_0 = arith.constant 0 : i32
    return %arg0, %c0_i32 : i32, i32
  }
}

</mosaic_0001>

<bundles_post_ra>
// kernel: tpu_custom_call.1
= control target key start
LH: loop header
LB: loop body
LE: loop exit
PB: predicated region body
PF: predicated region fallthrough
CT: control target
= control target key end

     0   :  { %s702_s12 = smov 0   ;;  %s874_s0 = inlined_call_operand.vmem [shape: f32[416,36], index: 0, kind: input, shape index: {}]   ;;  %s875_s1 = inlined_call_operand.vmem [shape: bf16[36,8], index: 1, kind: input, shape index: {}]   ;;  %s876_s2 = inlined_call_operand.vmem [shape: f32[1,8], index: 2, kind: input, shape index: {}]   ;;  %s877_s3 = inlined_call_operand.vmem [shape: f32[416,8], index: 3, kind: output, shape index: {}]  }
   0x1 LB: > { %s472_s13 = sadd.s32 4294967295, %s678_s12   ;;  %p476_p0 = scmp.ge.s32.totalorder %s678_s12, 1  ;;  %s678_s12 = sphi %s702_s12, %s13_s12  }
   0x2   : > { %p138_p1 = scmp.lt.s32.totalorder %s678_s12, 5 }
   0x4   : > { %p139_p2 = pnand %p476_p0, %p138_p1 }
   0x5   : > { %s162_s18 = smul.u32 (!%p139_p2), 13, %s472_s13 }
   0x6   : > { %142 = sbr.rel (%p139_p2) target bundleno = 261 (0x105), region = 32 }
   0x7   : > { %p163_p3 = scmp.lt.s32.totalorder (!%p139_p2), %s162_s18, 51 }
   0xb   : > { %v669_v0 = vld [vmem:[%s875_s1 + $0x10] ss:$0 sps:$4 sm:$0x33]   ;;  %v680_v1 = vmov 0.0   ;;  %vm310_vm0 = vcmask 1041408   ;;  %v670_v3 = vld [vmem:[%s875_s1 + $0x8] sm:$0xff]  }
   0xc   : > { %515 = vmatprep.subr.bf16.mxu0 %v680_v1  ;;  %549 = vmatprep.subr.bf16.mxu1 %v680_v1  ;;  %v312_v2 = vsel %vm310_vm0, %v669_v0, 0  ;;  %vm681_vm1 = vmmov 0   ;;  %v671_v4 = vld [vmem:[%s875_s1] sm:$0xff]   ;;  %s897_s18 = smov (!%p163_p3, %s162_s18), 51  ;;  %vm288_vm4 = vcmask 293888   ;;  %vm402_vm0 = vcmask 64512  }
   0xd   : > { %516 = vmatpush3.bf16.msra.mxu0 %v312_v2  ;;  %552 = vmatpush3.bf16.msra.mxu1 %v312_v2  ;;  %s477_s21 = sshll.u32 %s897_s18, 3 }
   0xe   : > { %517 = vmatprep.subr.bf16.mxu0 %v680_v1  ;;  %550 = vmatprep.subr.bf16.mxu1 %v680_v1  ;;  %s737_s24 = scalar_lea.vmem %s874_s0, %s477_s21  ;;  %s843_s29 = scalar_lea.vmem %s877_s3, %s477_s21 }
   0xf   : > { %521 = vmatprep.mubr.msk.bf16.mxu0 %vm681_vm1, %v680_v1  ;;  %537 = vmatprep.mubr.msk.bf16.mxu1 %vm681_vm1, %v680_v1  ;;  %v175_v5 = vld [vmem:[%s737_s24] sm:$0xff]  ;;  %v176_v6 = vld [vmem:[%s737_s24 + $0x8] sm:$0xff]  ;;  %v177_v12 = vld [vmem:[%s737_s24 + $0x10] sm:$0xff] }
  0x10   : > { %v183_v7 = vld [vmem:[%s737_s24 + $0x40] sm:$0xff]  ;;  %v479_v8 = vclamps-f32 %v175_v5, 0.9921875  ;;  %v480_v9 = vclamps-f32 %v176_v6, 0.9921875  ;;  %v184_v10 = vld [vmem:[%s737_s24 + $0x48] sm:$0xff]  ;;  %v178_v13 = vld [vmem:[%s737_s24 + $0x18] sm:$0xff]  ;;  %v481_v15 = vclamps-f32 %v177_v12, 0.9921875 }
  0x11   : > { %518 = vmatpush3.bf16.msra.mxu0 %v670_v3  ;;  %553 = vmatpush3.bf16.msra.mxu1 %v670_v3  ;;  %v487_v11 = vclamps-f32 %v183_v7, 0.9921875  ;;  %v488_v14 = vclamps-f32 %v184_v10, 0.9921875  ;;  %v482_v16 = vclamps-f32 %v178_v13, 0.9921875  ;;  %v185_v17 = vld [vmem:[%s737_s24 + $0x50] sm:$0xff]  ;;  %v186_v18 = vld [vmem:[%s737_s24 + $0x58] sm:$0xff]  ;;  %v179_v3 = vld [vmem:[%s737_s24 + $0x20] sm:$0xff] }
  0x12   : > { %519 = vmatprep.subr.bf16.mxu0 %v680_v1  ;;  %551 = vmatprep.subr.bf16.mxu1 %v680_v1  ;;  %v215_v19 = vmul.f32 128.0, %v479_v8  ;;  %v216_v20 = vmul.f32 128.0, %v480_v9  ;;  %v747_v23 = vmul.f32 128.0, %v481_v15  ;;  %v489_v25 = vclamps-f32 %v185_v17, 0.9921875  ;;  %v182_v51 = vld [vmem:[%s737_s24 + $0x38] sm:$0xff] }
  0x13   : > { %v223_v21 = vmul.f32 128.0, %v487_v11  ;;  %v224_v22 = vmul.f32 128.0, %v488_v14  ;;  %v749_v24 = vmul.f32 128.0, %v482_v16  ;;  %v490_v29 = vclamps-f32 %v186_v18, 0.9921875 }
  0x14   : > { %v555_v26 = vand.u32 2147483647, %v215_v19  ;;  %v557_v27 = vcvt.f32.s32 %v215_v19  ;;  %v563_v28 = vand.u32 2147483647, %v216_v20  ;;  %v560_v30 = vand.u32 2147483648, %v215_v19 }
  0x15   : > { %520 = vmatpush3.bf16.msra.mxu0 %v671_v4  ;;  %554 = vmatpush3.bf16.msra.mxu1 %v671_v4  ;;  %v565_v31 = vcvt.f32.s32 %v216_v20  ;;  %v619_v32 = vand.u32 2147483647, %v223_v21  ;;  %v621_v33 = vcvt.f32.s32 %v223_v21  ;;  %v568_v37 = vand.u32 2147483648, %v216_v20  ;;  %v180_v4 = vld [vmem:[%s737_s24 + $0x28] sm:$0xff] }
  0x16   : > { %vm751_vm2 = vcmp.lt.f32.partialorder %v555_v26, 8388608.0  ;;  %v558_v35 = vcvt.s32.f32 %v557_v27  ;;  %vm755_vm3 = vcmp.lt.f32.partialorder %v563_v28, 8388608.0  ;;  %v624_v40 = vand.u32 2147483648, %v223_v21  ;;  %v187_v28 = vld [vmem:[%s737_s24 + $0x60] sm:$0xff] }
  0x17   : > { %v566_v38 = vcvt.s32.f32 %v565_v31  ;;  %v622_v39 = vcvt.s32.f32 %v621_v33  ;;  %v627_v41 = vand.u32 2147483647, %v224_v22  ;;  %vm759_vm5 = vcmp.lt.f32.partialorder %v619_v32, 8388608.0 }
  0x18   : > { %v559_v42 = vand.u32 2147483647, %v558_v35  ;;  %v629_v44 = vcvt.f32.s32 %v224_v22  ;;  %v571_v45 = vand.u32 2147483647, %v747_v23  ;;  %v632_v48 = vand.u32 2147483648, %v224_v22 }
  0x19   : > { %v567_v46 = vand.u32 2147483647, %v566_v38  ;;  %v623_v47 = vand.u32 2147483647, %v622_v39  ;;  %v573_v49 = vcvt.f32.s32 %v747_v23  ;;  %vm765_vm6 = vcmp.lt.f32.partialorder %v627_v41, 8388608.0 }
  0x1a   : > { %v561_v50 = vor.u32 %v560_v30, %v559_v42  ;;  %v630_v52 = vcvt.s32.f32 %v629_v44  ;;  %vm769_vm7 = vcmp.lt.f32.partialorder %v571_v45, 8388608.0  ;;  %v576_v57 = vand.u32 2147483648, %v747_v23 }
  0x1b   : > { %v569_v54 = vor.u32 %v568_v37, %v567_v46  ;;  %v625_v55 = vor.u32 %v624_v40, %v623_v47  ;;  %v574_v56 = vcvt.s32.f32 %v573_v49  ;;  %v579_v60 = vand.u32 2147483647, %v749_v24  ;;  %v181_v47 = vld [vmem:[%s737_s24 + $0x30] sm:$0xff] }
  0x1c   : > { %v562_v58 = vsel %vm751_vm2, %v561_v50, %v215_v19  ;;  %v631_v59 = vand.u32 2147483647, %v630_v52  ;;  %v581_v61 = vcvt.f32.s32 %v749_v24  ;;  %v584_v8 = vand.u32 2147483648, %v749_v24 }
  0x1d   : > { %v570_v62 = vsel %vm755_vm3, %v569_v54, %v216_v20  ;;  %v241_v63 = vmul.f32 0.0078125, %v562_v58  ;;  %v626_v0 = vsel %vm759_vm5, %v625_v55, %v223_v21  ;;  %v575_v2 = vand.u32 2147483647, %v574_v56 }
  0x1e   : > { %v242_v5 = vmul.f32 0.0078125, %v570_v62  ;;  %v633_v6 = vor.u32 %v632_v48, %v631_v59  ;;  %v249_v7 = vmul.f32 0.0078125, %v626_v0  ;;  %v582_v10 = vcvt.s32.f32 %v581_v61 }
  0x1f   : > { %v577_v9 = vor.u32 %v576_v57, %v575_v2  ;;  %v225_v11 = vmul.f32 128.0, %v489_v25  ;;  %v226_v12 = vmul.f32 128.0, %v490_v29  ;;  %v483_v15 = vclamps-f32 %v179_v3, 0.9921875 }
  0x20   : > { %v254_v13 = vpack.c.bf16 %v242_v5, %v241_v63  ;;  %v634_v14 = vsel %vm765_vm6, %v633_v6, %v224_v22  ;;  %v484_v16 = vclamps-f32 %v180_v4, 0.9921875  ;;  %v583_v19 = vand.u32 2147483647, %v582_v10 }
  0x21   : > { %v250_v17 = vmul.f32 0.0078125, %v634_v14  ;;  %v578_v18 = vsel %vm769_vm7, %v577_v9, %v747_v23  ;;  %v635_v20 = vand.u32 2147483647, %v225_v11  ;;  %vm791_vm8 = vcmp.lt.f32.partialorder %v579_v60, 8388608.0 }
  0x22   : > { %522 = vmatmul.mubr.msk.bf16.vlgmr.msra.gmra.mxu0 %vm288_vm4, %v254_v13  ;;  %v243_v25 = vmul.f32 0.0078125, %v578_v18  ;;  %v637_v26 = vcvt.f32.s32 %v225_v11  ;;  %v640_v27 = vand.u32 2147483648, %v225_v11  ;;  %v585_v29 = vor.u32 %v584_v8, %v583_v19 }
  0x23   : > { %v258_v22 = vpack.c.bf16 %v250_v17, %v249_v7  ;;  %525 = vmatprep.mubr.msk.bf16.mxu0 %vm681_vm1, %v680_v1  ;;  %v643_v30 = vand.u32 2147483647, %v226_v12  ;;  %v645_v31 = vcvt.f32.s32 %v226_v12  ;;  %vm798_vm9 = vcmp.lt.f32.partialorder %v635_v20, 8388608.0 }
  0x24   : > { %v638_v32 = vcvt.s32.f32 %v637_v26  ;;  %v648_v33 = vand.u32 2147483648, %v226_v12  ;;  %v219_v34 = vmul.f32 128.0, %v483_v15  ;;  %v586_v35 = vsel %vm791_vm8, %v585_v29, %v749_v24 }
  0x25   : > { %538 = vmatmul.mubr.msk.bf16.vlgmr.msra.gmra.mxu1 %vm288_vm4, %v258_v22  ;;  %v646_v36 = vcvt.s32.f32 %v645_v31  ;;  %v220_v37 = vmul.f32 128.0, %v484_v16  ;;  %v491_v38 = vclamps-f32 %v187_v28, 0.9921875  ;;  %v244_v39 = vmul.f32 0.0078125, %v586_v35 }
  0x26   : > { %541 = vmatprep.mubr.msk.bf16.mxu1 %vm681_vm1, %v680_v1  ;;  %v639_v40 = vand.u32 2147483647, %v638_v32  ;;  %v587_v41 = vand.u32 2147483647, %v219_v34  ;;  %v589_v42 = vcvt.f32.s32 %v219_v34  ;;  %vm808_vm10 = vcmp.lt.f32.partialorder %v643_v30, 8388608.0 }
  0x27   : > { %v647_v44 = vand.u32 2147483647, %v646_v36  ;;  %v592_v45 = vand.u32 2147483648, %v219_v34  ;;  %v597_v46 = vcvt.f32.s32 %v220_v37  ;;  %v255_v24 = vpack.c.bf16 %v244_v39, %v243_v25  ;;  %v492_v39 = vld [vmem:[%s876_s2] ss:$0 sm:$0xff] }
  0x28   : > { %v641_v48 = vor.u32 %v640_v27, %v639_v40  ;;  %v590_v49 = vcvt.s32.f32 %v589_v42  ;;  %v595_v50 = vand.u32 2147483647, %v220_v37  ;;  %vm814_vm11 = vcmp.lt.f32.partialorder %v587_v41, 8388608.0 }
  0x29   : > { %v649_v52 = vor.u32 %v648_v33, %v647_v44  ;;  %v598_v54 = vcvt.s32.f32 %v597_v46  ;;  %v600_v55 = vand.u32 2147483648, %v220_v37  ;;  %v227_v58 = vmul.f32 128.0, %v491_v38 }
  0x2a   : > { %526 = vmatmul.mubr.msk.bf16.gmra.mxu0 %vm288_vm4, %v255_v24  ;;  %v642_v56 = vsel %vm798_vm9, %v641_v48, %v225_v11  ;;  %v591_v57 = vand.u32 2147483647, %v590_v49  ;;  %v485_v59 = vclamps-f32 %v181_v47, 0.9921875  ;;  %v486_v63 = vclamps-f32 %v182_v51, 0.9921875 }
  0x2b   : > { %v650_v60 = vsel %vm808_vm10, %v649_v52, %v226_v12  ;;  %v251_v61 = vmul.f32 0.0078125, %v642_v56  ;;  %529 = vmatprep.mubr.msk.bf16.mxu0 %vm681_vm1, %v680_v1  ;;  %v599_v62 = vand.u32 2147483647, %v598_v54  ;;  %vm596_vm12 = vcmp.lt.f32.partialorder %v595_v50, 8388608.0 }
  0x2c   : > { %v252_v0 = vmul.f32 0.0078125, %v650_v60  ;;  %v593_v2 = vor.u32 %v592_v45, %v591_v57  ;;  %v653_v3 = vcvt.f32.s32 %v227_v58  ;;  %v651_v5 = vand.u32 2147483647, %v227_v58 }
  0x2d   : > { %v601_v4 = vor.u32 %v600_v55, %v599_v62  ;;  %v221_v6 = vmul.f32 128.0, %v485_v59  ;;  %v222_v7 = vmul.f32 128.0, %v486_v63  ;;  %v656_v11 = vand.u32 2147483648, %v227_v58 }
  0x2e   : > { %v259_v8 = vpack.c.bf16 %v252_v0, %v251_v61  ;;  %v594_v9 = vsel %vm814_vm11, %v593_v2, %v219_v34  ;;  %v654_v10 = vcvt.s32.f32 %v653_v3  ;;  %vm652_vm13 = vcmp.lt.f32.partialorder %v651_v5, 8388608.0 }
  0x2f   : > { %v602_v12 = vsel %vm596_vm12, %v601_v4, %v220_v37  ;;  %v245_v13 = vmul.f32 0.0078125, %v594_v9  ;;  %v605_v14 = vcvt.f32.s32 %v221_v6  ;;  %v603_v17 = vand.u32 2147483647, %v221_v6 }
  0x30   : > { %542 = vmatmul.mubr.msk.bf16.gmra.mxu1 %vm288_vm4, %v259_v8  ;;  %v246_v15 = vmul.f32 0.0078125, %v602_v12  ;;  %v655_v16 = vand.u32 2147483647, %v654_v10  ;;  %v608_v19 = vand.u32 2147483648, %v221_v6  ;;  %v613_v20 = vcvt.f32.s32 %v222_v7 }
  0x31   : > { %545 = vmatprep.mubr.msk.bf16.mxu1 %vm681_vm1, %v680_v1  ;;  %v606_v18 = vcvt.s32.f32 %v605_v14  ;;  %v611_v26 = vand.u32 2147483647, %v222_v7  ;;  %v616_v22 = vand.u32 2147483648, %v222_v7  ;;  %vm604_vm14 = vcmp.lt.f32.partialorder %v603_v17, 8388608.0 }
  0x32   : > { %v256_v21 = vpack.c.bf16 %v246_v15, %v245_v13  ;;  %v657_v25 = vor.u32 %v656_v11, %v655_v16  ;;  %v614_v28 = vcvt.s32.f32 %v613_v20 }
  0x33   : > { %v607_v27 = vand.u32 2147483647, %v606_v18  ;;  %vm612_vm15 = vcmp.lt.f32.partialorder %v611_v26, 8388608.0 }
  0x34   : > { %530 = vmatmul.mubr.msk.bf16.gmra.mxu0 %vm288_vm4, %v256_v21  ;;  %v658_v29 = vsel %vm652_vm13, %v657_v25, %v227_v58  ;;  %v615_v23 = vand.u32 2147483647, %v614_v28 }
  0x35   : > { %v253_v30 = vmul.f32 0.0078125, %v658_v29  ;;  %533 = vmatprep.mubr.msk.bf16.mxu0 %vm681_vm1, %v680_v1  ;;  %v609_v31 = vor.u32 %v608_v19, %v607_v27 }
  0x36   : > { %v617_v34 = vor.u32 %v616_v22, %v615_v23 }
  0x37   : > { %v260_v32 = vpack.c.bf16 %v253_v30, %v253_v30  ;;  %v610_v33 = vsel %vm604_vm14, %v609_v31, %v221_v6 }
  0x38   : > { %v247_v35 = vmul.f32 0.0078125, %v610_v33  ;;  %v618_v36 = vsel %vm612_vm15, %v617_v34, %v222_v7 }
  0x39   : > { %546 = vmatmul.mubr.msk.bf16.gmra.mxu1 %vm288_vm4, %v260_v32  ;;  %v248_v37 = vmul.f32 0.0078125, %v618_v36 }
  0x3b   : > { %v257_v38 = vpack.c.bf16 %v248_v37, %v247_v35 }
  0x3d   : > { %534 = vmatmul.mubr.msk.bf16.gmra.mxu0 %vm288_vm4, %v257_v38 }
  0xe2   : > { %v348_v1 = vpop.f32.mrf.mxu0 }
  0xe3   : > { %v349_v40 = vadd.f32 %v492_v39, %v348_v1 }
  0xe4   : > { %v523_v41 = vpop.f32.mrf.mxu0 }
  0xe5   : > { %403 = vst.msk [vmem:[%s843_s29] sm:$0xff] %vm402_vm0, %v349_v40  ;;  %v380_v42 = vpop.f32.mrf.mxu1 }
  0xe6   : > { %v381_v43 = vadd.f32 %v492_v39, %v380_v42  ;;  %v351_v44 = vpop.f32.mrf.mxu0 }
  0xe7   : > { %v352_v45 = vadd.f32 %v492_v39, %v351_v44  ;;  %v539_v46 = vpop.f32.mrf.mxu1 }
  0xe8   : > { %411 = vst.msk [vmem:[%s843_s29 + $0x40] sm:$0xff] %vm402_vm0, %v381_v43  ;;  %v524_v47 = vpop.f32.mrf.mxu0 }
  0xe9   : > { %404 = vst.msk [vmem:[%s843_s29 + $0x8] sm:$0xff] %vm402_vm0, %v352_v45  ;;  %v383_v24 = vpop.f32.mrf.mxu1 }
  0xea   : > { %v384_v48 = vadd.f32 %v492_v39, %v383_v24  ;;  %v356_v49 = vpop.f32.mrf.mxu0 }
  0xeb   : > { %v357_v50 = vadd.f32 %v492_v39, %v356_v49  ;;  %v540_v51 = vpop.f32.mrf.mxu1 }
  0xec   : > { %412 = vst.msk [vmem:[%s843_s29 + $0x48] sm:$0xff] %vm402_vm0, %v384_v48  ;;  %v527_v52 = vpop.f32.mrf.mxu0 }
  0xed   : > { %405 = vst.msk [vmem:[%s843_s29 + $0x10] sm:$0xff] %vm402_vm0, %v357_v50 }
  0xee   : > { %v359_v53 = vpop.f32.mrf.mxu0 }
  0xef   : > { %v360_v54 = vadd.f32 %v492_v39, %v359_v53 }
  0xf0   : > { %v388_v55 = vpop.f32.mrf.mxu1  ;;  %v528_v56 = vpop.f32.mrf.mxu0 }
  0xf1   : > { %v389_v57 = vadd.f32 %v492_v39, %v388_v55  ;;  %406 = vst.msk [vmem:[%s843_s29 + $0x18] sm:$0xff] %vm402_vm0, %v360_v54 }
  0xf2   : > { %v543_v58 = vpop.f32.mrf.mxu1 }
  0xf3   : > { %413 = vst.msk [vmem:[%s843_s29 + $0x50] sm:$0xff] %vm402_vm0, %v389_v57 }
  0xf4   : > { %v391_v59 = vpop.f32.mrf.mxu1  ;;  %v364_v60 = vpop.f32.mrf.mxu0 }
  0xf5   : > { %v392_v61 = vadd.f32 %v492_v39, %v391_v59  ;;  %v365_v62 = vadd.f32 %v492_v39, %v364_v60 }
  0xf6   : > { %v544_v63 = vpop.f32.mrf.mxu1  ;;  %v531_v0 = vpop.f32.mrf.mxu0 }
  0xf7   : > { %414 = vst.msk [vmem:[%s843_s29 + $0x58] sm:$0xff] %vm402_vm0, %v392_v61  ;;  %407 = vst.msk [vmem:[%s843_s29 + $0x20] sm:$0xff] %vm402_vm0, %v365_v62 }
  0xf8   : > { %v367_v2 = vpop.f32.mrf.mxu0 }
  0xf9   : > { %v396_v3 = vpop.f32.mrf.mxu1  ;;  %v368_v4 = vadd.f32 %v492_v39, %v367_v2 }
  0xfa   : > { %v397_v5 = vadd.f32 %v492_v39, %v396_v3  ;;  %v532_v6 = vpop.f32.mrf.mxu0 }
  0xfb   : > { %408 = vst.msk [vmem:[%s843_s29 + $0x28] sm:$0xff] %vm402_vm0, %v368_v4  ;;  %v547_v7 = vpop.f32.mrf.mxu1 }
  0xfc   : > { %415 = vst.msk [vmem:[%s843_s29 + $0x60] sm:$0xff] %vm402_vm0, %v397_v5 }
  0xfd   : > { %v399_v8 = vpop.f32.mrf.mxu1  ;;  %v372_v9 = vpop.f32.mrf.mxu0 }
  0xfe   : > { %v373_v10 = vadd.f32 %v492_v39, %v372_v9 }
  0xff   : > { %v548_v11 = vpop.f32.mrf.mxu1  ;;  %v535_v12 = vpop.f32.mrf.mxu0 }
 0x100   : > { %409 = vst.msk [vmem:[%s843_s29 + $0x30] sm:$0xff] %vm402_vm0, %v373_v10 }
 0x101   : > { %v375_v13 = vpop.f32.mrf.mxu0 }
 0x102   : > { %v376_v14 = vadd.f32 %v492_v39, %v375_v13 }
 0x103   : > { %v536_v15 = vpop.f32.mrf.mxu0 }
 0x104   : > { %410 = vst.msk [vmem:[%s843_s29 + $0x38] sm:$0xff] %vm402_vm0, %v376_v14 }
 0x105 PF: > { %s13_s12 = sadd.s32 1, %s678_s12  }
 0x106   : > { %p10_p4 = scmp.ge.s32.totalorder %s13_s12, 6  }
 0x108   :  { %12 = sbr.rel (!%p10_p4) target bundleno = 1 (0x1), region = 62 }

</bundles_post_ra>
